<compile_context>
chip_gen: v6e
topology: v6e:2x2x1
jax: 0.10.0
libtpu: 0.0.40
codegen_flags: <defaults>
</compile_context>

<pallas_src>
import math
from functools import partial

import jax
import jax.numpy as jnp
from jax import lax
from jax.experimental import pallas as pl
from jax.experimental.pallas import tpu as pltpu


def _round_up(x, m):
    return (x + m - 1) // m * m


def _pick_div_tile(p, candidates=(512, 384, 256, 128)):
    """Largest candidate (multiple of 128) that divides p (p is a 128-multiple)."""
    for t in candidates:
        if p % t == 0:
            return t
    return 128


# ----------------------------------------------------------------------------
# Pallas kernel 1: fused matmul
#   out = [relu]( prologue(A) @ B + bias )
#   prologue(A) = relu(A * col_scale + col_shift)   (per K column, optional;
#   used to fuse BatchNorm->ReLU preceding a 1x1 conv)
# A may be f32 or bf16; it is cast to bf16 right before the MXU dot. B is bf16.
# Accumulation in an f32 VMEM scratch; reduction axis is the last grid axis.
# ----------------------------------------------------------------------------

def _matmul_kernel(a_ref, b_ref, scale_ref, shift_ref, bias_ref, o_ref, acc_ref,
                   *, prologue, epilogue_relu):
    @pl.when(pl.program_id(2) == 0)
    def _():
        acc_ref[...] = jnp.zeros_like(acc_ref)

    a = a_ref[...]
    if prologue:
        a = a.astype(jnp.float32) * scale_ref[...] + shift_ref[...]
        a = jnp.maximum(a, 0.0)
    a = a.astype(jnp.bfloat16)
    acc_ref[...] += jnp.dot(a, b_ref[...], preferred_element_type=jnp.float32)

    @pl.when(pl.program_id(2) == pl.num_programs(2) - 1)
    def _():
        out = acc_ref[...] + bias_ref[...]
        if epilogue_relu:
            out = jnp.maximum(out, 0.0)
        o_ref[...] = out.astype(o_ref.dtype)


@partial(jax.jit, static_argnames=("tm", "tn", "tk", "prologue", "epilogue_relu"))
def _matmul_padded(a_p, b_p, scale_p, shift_p, bias_p, *, tm, tn, tk,
                   prologue, epilogue_relu):
    Mp, Kp = a_p.shape
    _, Np = b_p.shape
    return pl.pallas_call(
        partial(_matmul_kernel, prologue=prologue, epilogue_relu=epilogue_relu),
        out_shape=jax.ShapeDtypeStruct((Mp, Np), jnp.float32),
        grid_spec=pltpu.PrefetchScalarGridSpec(
            num_scalar_prefetch=0,
            grid=(Mp // tm, Np // tn, Kp // tk),
            in_specs=[
                pl.BlockSpec((tm, tk), lambda i, j, k: (i, k)),
                pl.BlockSpec((tk, tn), lambda i, j, k: (k, j)),
                pl.BlockSpec((1, tk), lambda i, j, k: (0, k)),
                pl.BlockSpec((1, tk), lambda i, j, k: (0, k)),
                pl.BlockSpec((1, tn), lambda i, j, k: (0, j)),
            ],
            out_specs=pl.BlockSpec((tm, tn), lambda i, j, k: (i, j)),
            scratch_shapes=[pltpu.VMEM((tm, tn), jnp.float32)]),
        compiler_params=pltpu.CompilerParams(
            dimension_semantics=("parallel", "parallel", "arbitrary")),
    )(a_p, b_p, scale_p, shift_p, bias_p)


def pallas_matmul(a, b, bias=None, col_scale=None, col_shift=None,
                  epilogue_relu=False):
    """a: (M, K) f32/bf16; b: (K, N) bf16; bias: (N,) f32 (or None).
    Optional fused per-K-column affine + ReLU prologue (BatchNorm->ReLU)."""
    M, K = a.shape
    K2, N = b.shape
    assert K == K2
    prologue = col_scale is not None

    tm = min(512, _round_up(M, 32))
    Mp = _round_up(M, tm)
    Kp = _round_up(K, 128)
    tk = _pick_div_tile(Kp)
    Np = _round_up(N, 128)
    tn = _pick_div_tile(Np)

    a_p = jnp.pad(a, ((0, Mp - M), (0, Kp - K)))
    b_p = jnp.pad(b, ((0, Kp - K), (0, Np - N)))
    if bias is None:
        bias = jnp.zeros((N,), jnp.float32)
    bias_p = jnp.pad(bias.astype(jnp.float32).reshape(1, -1),
                     ((0, 0), (0, Np - N)))
    if prologue:
        scale_p = jnp.pad(col_scale.astype(jnp.float32).reshape(1, -1),
                          ((0, 0), (0, Kp - K)))
        shift_p = jnp.pad(col_shift.astype(jnp.float32).reshape(1, -1),
                          ((0, 0), (0, Kp - K)))
    else:
        scale_p = jnp.zeros((1, Kp), jnp.float32)
        shift_p = jnp.zeros((1, Kp), jnp.float32)

    out = _matmul_padded(a_p, b_p, scale_p, shift_p, bias_p,
                         tm=tm, tn=tn, tk=tk,
                         prologue=prologue, epilogue_relu=epilogue_relu)
    return out[:M, :N]


# ----------------------------------------------------------------------------
# Pallas kernel 2: per-channel affine (+ ReLU), large row tiles, f32/bf16 out.
# Used for the conv->ReLU->BatchNorm pattern and the encoder stem norm0.
# ----------------------------------------------------------------------------

def _affine_kernel(x_ref, scale_ref, shift_ref, o_ref, *, apply_relu):
    y = x_ref[...] * scale_ref[...] + shift_ref[...]
    if apply_relu:
        y = jnp.maximum(y, 0.0)
    o_ref[...] = y.astype(o_ref.dtype)


@partial(jax.jit, static_argnames=("tr", "apply_relu", "out_dtype"))
def _affine_padded(x_p, s_p, b_p, *, tr, apply_relu, out_dtype):
    Rp, Cp = x_p.shape
    return pl.pallas_call(
        partial(_affine_kernel, apply_relu=apply_relu),
        out_shape=jax.ShapeDtypeStruct((Rp, Cp), out_dtype),
        grid_spec=pltpu.PrefetchScalarGridSpec(
            num_scalar_prefetch=0,
            grid=(Rp // tr,),
            in_specs=[pl.BlockSpec((tr, Cp), lambda i: (i, 0)),
                      pl.BlockSpec((1, Cp), lambda i: (0, 0)),
                      pl.BlockSpec((1, Cp), lambda i: (0, 0))],
            out_specs=pl.BlockSpec((tr, Cp), lambda i: (i, 0))),
        compiler_params=pltpu.CompilerParams(
            dimension_semantics=("parallel",)),
    )(x_p, s_p, b_p)


def pallas_affine(x2d, scale, shift, apply_relu=False, out_dtype=jnp.float32):
    R, C = x2d.shape
    Cp = _round_up(C, 128)
    # target ~2 MiB f32 blocks (fits comfortably in every generation's VMEM)
    max_rows = max(32, (2 * 1024 * 1024) // (4 * Cp) // 32 * 32)
    tr = min(_round_up(R, 32), max_rows, 2048)
    Rp = _round_up(R, tr)
    x_p = jnp.pad(x2d, ((0, Rp - R), (0, Cp - C)))
    s_p = jnp.pad(scale.astype(jnp.float32).reshape(1, -1), ((0, 0), (0, Cp - C)))
    b_p = jnp.pad(shift.astype(jnp.float32).reshape(1, -1), ((0, 0), (0, Cp - C)))
    out = _affine_padded(x_p, s_p, b_p, tr=tr, apply_relu=apply_relu,
                         out_dtype=out_dtype)
    return out[:R, :C]


# ----------------------------------------------------------------------------
# Glue ops (plain JAX): im2col, conv wrapper, BN stats, pooling, upsample
# ----------------------------------------------------------------------------

def _im2col(x, k, stride, pad):
    N, H, W, C = x.shape
    xp = jnp.pad(x, ((0, 0), (pad, pad), (pad, pad), (0, 0)))
    Ho = (H + 2 * pad - k) // stride + 1
    Wo = (W + 2 * pad - k) // stride + 1
    cols = []
    for di in range(k):
        for dj in range(k):
            cols.append(xp[:, di:di + stride * Ho:stride,
                           dj:dj + stride * Wo:stride, :])
    patches = jnp.concatenate(cols, axis=-1) if len(cols) > 1 else cols[0]
    return patches.reshape(N * Ho * Wo, k * k * C), (N, Ho, Wo)


def conv2d(x, w, bias=None, stride=1, pad=0, relu=False, col_affine=None):
    """x: (N,H,W,Cin) f32/bf16, w: (kh,kw,Cin,Cout) bf16 -> (N,Ho,Wo,Cout) f32.
    col_affine=(scale, shift) fuses relu(x*scale+shift) per input channel into
    the matmul prologue (only used for 1x1 convs, where no zero-pad exists)."""
    kh, kw, cin, cout = w.shape
    if kh == 1 and kw == 1 and stride == 1 and pad == 0:
        N, H, W, _ = x.shape
        a = x.reshape(N * H * W, cin)
        dims = (N, H, W)
    else:
        assert col_affine is None  # pad pixels must stay exactly zero
        a, dims = _im2col(x.astype(jnp.bfloat16), kh, stride, pad)
    if col_affine is not None:
        col_scale, col_shift = col_affine
    else:
        col_scale = col_shift = None
    out = pallas_matmul(a, w.reshape(kh * kw * cin, cout), bias,
                        col_scale, col_shift, epilogue_relu=relu)
    N, Ho, Wo = dims
    return out.reshape(N, Ho, Wo, cout)


def bn_scale_shift(x, gamma, beta, eps=1e-5):
    """Train-mode BatchNorm2d statistics (biased variance) -> per-channel affine."""
    c = x.shape[-1]
    x2d = x.reshape(-1, c).astype(jnp.float32)
    mean = jnp.mean(x2d, axis=0)
    var = jnp.var(x2d, axis=0)
    scale = gamma * lax.rsqrt(var + eps)
    shift = beta - mean * scale
    return scale, shift


def batchnorm_apply(x, gamma, beta, relu=False, out_dtype=jnp.float32, eps=1e-5):
    N, H, W, C = x.shape
    scale, shift = bn_scale_shift(x, gamma, beta, eps)
    y = pallas_affine(x.reshape(N * H * W, C), scale, shift,
                      apply_relu=relu, out_dtype=out_dtype)
    return y.reshape(N, H, W, C)


def maxpool_3x3_s2_p1(x):
    N, H, W, C = x.shape
    neg = jnp.finfo(x.dtype).min
    xp = jnp.pad(x, ((0, 0), (1, 1), (1, 1), (0, 0)), constant_values=neg)
    Ho = (H + 2 - 3) // 2 + 1
    Wo = (W + 2 - 3) // 2 + 1
    out = None
    for di in range(3):
        for dj in range(3):
            v = xp[:, di:di + 2 * Ho:2, dj:dj + 2 * Wo:2, :]
            out = v if out is None else jnp.maximum(out, v)
    return out


def maxpool_2x2(x):
    N, H, W, C = x.shape
    return x.reshape(N, H // 2, 2, W // 2, 2, C).max(axis=(2, 4))


def avgpool_2x2(x):
    N, H, W, C = x.shape
    return x.reshape(N, H // 2, 2, W // 2, 2, C).mean(axis=(2, 4))


def upsample_bilinear_x2(x):
    """F.interpolate(scale_factor=2, mode='bilinear', align_corners=False),
    gather-free: each output pixel is a fixed {0.75, 0.25} blend of <=2
    neighbors per axis (edge-replicated), built from slices + weighted adds."""
    def up_axis(v, axis):
        L = v.shape[axis]
        first = lax.slice_in_dim(v, 0, 1, axis=axis)
        last = lax.slice_in_dim(v, L - 1, L, axis=axis)
        prev = jnp.concatenate(
            [first, lax.slice_in_dim(v, 0, L - 1, axis=axis)], axis=axis)
        nxt = jnp.concatenate(
            [lax.slice_in_dim(v, 1, L, axis=axis), last], axis=axis)
        even = 0.75 * v + 0.25 * prev
        odd = 0.75 * v + 0.25 * nxt
        out = jnp.stack([even, odd], axis=axis + 1)
        new_shape = v.shape[:axis] + (2 * L,) + v.shape[axis + 1:]
        return out.reshape(new_shape)

    x = up_axis(x, 1)
    x = up_axis(x, 2)
    return x


# ----------------------------------------------------------------------------
# DenseNet-169 encoder + UNet decoder (parameters initialized deterministically)
# ----------------------------------------------------------------------------

GROWTH = 32
BLOCK_CONFIG = (6, 12, 32, 32)   # densenet169
NUM_INIT_FEATURES = 64
BN_SIZE = 4
NUM_FILTERS = 32
NUM_CLASSES = 3


class _Init:
    def __init__(self, seed=0):
        self.key = jax.random.PRNGKey(seed)
        self.n = 0

    def _next(self):
        self.n += 1
        return jax.random.fold_in(self.key, self.n)

    def conv(self, kh, kw, cin, cout):
        fan_in = kh * kw * cin
        w = jax.random.normal(self._next(), (kh, kw, cin, cout), jnp.float32)
        return (w / math.sqrt(fan_in)).astype(jnp.bfloat16)   # bf16 weights

    def bias(self, c):
        return jax.random.normal(self._next(), (c,), jnp.float32) * 0.01

    def bn(self, c):
        return (jnp.ones((c,), jnp.float32), jnp.zeros((c,), jnp.float32))


def init_params(seed=0):
    ini = _Init(seed)
    P = {}
    # encoder stem
    P['conv0_w'] = ini.conv(7, 7, 3, NUM_INIT_FEATURES)
    P['norm0'] = ini.bn(NUM_INIT_FEATURES)
    feats = NUM_INIT_FEATURES
    for bi, nlayers in enumerate(BLOCK_CONFIG):
        layers = []
        for li in range(nlayers):
            cin = feats + li * GROWTH
            layers.append(dict(
                n1=ini.bn(cin),
                c1=ini.conv(1, 1, cin, BN_SIZE * GROWTH),
                n2=ini.bn(BN_SIZE * GROWTH),
                c2=ini.conv(3, 3, BN_SIZE * GROWTH, GROWTH),
            ))
        P[f'db{bi + 1}'] = layers
        feats = feats + nlayers * GROWTH
        if bi != len(BLOCK_CONFIG) - 1:
            P[f'tr{bi + 1}'] = dict(n=ini.bn(feats),
                                    c=ini.conv(1, 1, feats, feats // 2))
            feats = feats // 2

    # decoder
    def conv_relu_p(cin, cout):
        return dict(w=ini.conv(3, 3, cin, cout), b=ini.bias(cout), bn=ini.bn(cout))

    def dec_block_p(cin, cmid, cout):
        return dict(cr1=conv_relu_p(cin, cmid), cr2=conv_relu_p(cmid, cout))

    nf = NUM_FILTERS
    P['center'] = dec_block_p(1664, nf * 8 * 2, nf * 8)
    P['dec5'] = dec_block_p(1664 + nf * 8, nf * 8 * 2, nf * 8)
    P['dec4'] = dec_block_p(1280 + nf * 8, nf * 8 * 2, nf * 8)
    P['dec3'] = dec_block_p(512 + nf * 8, nf * 4 * 2, nf * 2)
    P['dec2'] = dec_block_p(256 + nf * 2, nf * 2 * 2, nf * 2 * 2)
    P['dec1'] = dec_block_p(nf * 2 * 2, nf * 2 * 2, nf)
    P['dec_seg'] = conv_relu_p(nf, nf)
    P['final_w'] = ini.conv(1, 1, nf, NUM_CLASSES)
    P['final_b'] = ini.bias(NUM_CLASSES)
    return P


# ----------------------------------------------------------------------------
# Forward pass
# ----------------------------------------------------------------------------

def conv_relu_block(x, p):
    # ConvRelu: Conv3x3(pad=1, bias) -> ReLU (fused epilogue) -> BatchNorm -> Dropout
    y = conv2d(x, p['w'], bias=p['b'], stride=1, pad=1, relu=True)
    g, b = p['bn']
    y = batchnorm_apply(y, g, b, relu=False)
    # TODO(synk): nn.Dropout(p=0.3) (train mode, stochastic) treated as identity.
    return y


def decoder_block(x, p):
    # DecoderBlockV2 with is_deconv=False: bilinear x2 -> ConvRelu -> ConvRelu
    x = upsample_bilinear_x2(x)
    x = conv_relu_block(x, p['cr1'])
    x = conv_relu_block(x, p['cr2'])
    return x


def dense_layer(x, p):
    # norm1 -> relu -> conv1x1  : fused as matmul prologue (no HBM round trip)
    s1, t1 = bn_scale_shift(x, *p['n1'])
    y = conv2d(x, p['c1'], col_affine=(s1, t1))               # 1x1, no bias
    # norm2 -> relu            : Pallas affine, bf16 output feeding im2col
    y = batchnorm_apply(y, *p['n2'], relu=True, out_dtype=jnp.bfloat16)
    y = conv2d(y, p['c2'], stride=1, pad=1)                   # 3x3, no bias
    return jnp.concatenate([x, y], axis=-1)


def dense_block(x, layers):
    for p in layers:
        x = dense_layer(x, p)
    return x


def transition(x, p):
    # norm -> relu -> conv1x1 (fused prologue) -> avgpool2x2
    s, t = bn_scale_shift(x, *p['n'])
    y = conv2d(x, p['c'], col_affine=(s, t))                  # 1x1, no bias
    return avgpool_2x2(y)


def dense_unet_forward(x_nchw, P):
    x = jnp.transpose(x_nchw, (0, 2, 3, 1)).astype(jnp.float32)  # NCHW -> NHWC

    # conv1 = conv0 -> norm0 -> relu0 -> pool0
    c = conv2d(x, P['conv0_w'], stride=2, pad=3)
    g, b = P['norm0']
    c = batchnorm_apply(c, g, b, relu=True)
    conv1 = maxpool_3x3_s2_p1(c)

    conv2 = dense_block(conv1, P['db1'])
    tr1 = transition(conv2, P['tr1'])
    conv3 = dense_block(tr1, P['db2'])
    tr2 = transition(conv3, P['tr2'])
    conv4 = dense_block(tr2, P['db3'])
    tr3 = transition(conv4, P['tr3'])
    conv5 = dense_block(tr3, P['db4'])

    center = decoder_block(maxpool_2x2(conv5), P['center'])
    dec5 = decoder_block(jnp.concatenate([center, conv5], axis=-1), P['dec5'])
    dec4 = decoder_block(jnp.concatenate([dec5, conv4], axis=-1), P['dec4'])
    dec3 = decoder_block(jnp.concatenate([dec4, conv3], axis=-1), P['dec3'])
    dec2 = decoder_block(jnp.concatenate([dec3, conv2], axis=-1), P['dec2'])
    dec1 = decoder_block(dec2, P['dec1'])
    dec_seg = conv_relu_block(dec1, P['dec_seg'])
    out = conv2d(dec_seg, P['final_w'], bias=P['final_b'], stride=1, pad=0)

    return jnp.transpose(out, (0, 3, 1, 2))       # NHWC -> NCHW


if __name__ == "__main__":
    # Input spatial size must be a multiple of 64 (encoder downsamples by 32,
    # extra pool before center downsamples once more).  Smallest valid: 64x64.
    key = jax.random.PRNGKey(0)
    x = jax.random.normal(key, (2, 3, 64, 64), jnp.float32)

    params = init_params(seed=0)
    y = dense_unet_forward(x, params)
    y = jax.block_until_ready(y)

    assert y.shape == (2, NUM_CLASSES, 64, 64), y.shape
    assert bool(jnp.all(jnp.isfinite(y)))
    print("KERNEL_OK")
</pallas_src>

<mosaic_0001>
module attributes {stable_mosaic.version = 11 : i64} {
  func.func @_matmul_kernel(%arg0: i32, %arg1: i32, %arg2: i32, %arg3: memref<512x256xbf16, #tpu.memory_space<vmem>>, %arg4: memref<256x128xbf16, #tpu.memory_space<vmem>>, %arg5: memref<1x256xf32, #tpu.memory_space<vmem>>, %arg6: memref<1x256xf32, #tpu.memory_space<vmem>>, %arg7: memref<1x128xf32, #tpu.memory_space<vmem>>, %arg8: memref<512x128xf32, #tpu.memory_space<vmem>>, %arg9: memref<512x128xf32, #tpu.memory_space<vmem>>) attributes {dimension_semantics = [#tpu.dimension_semantics<parallel>, #tpu.dimension_semantics<parallel>, #tpu.dimension_semantics<arbitrary>], iteration_bounds = array<i64: 4, 1, 1>, scalar_prefetch = 0 : i64, scratch_operands = 1 : i64, tpu.core_type = #tpu.core_type<tc>, window_params = [{transform_indices = @transform_0, window_bounds = array<i64: 512, 256>}, {transform_indices = @transform_1, window_bounds = array<i64: 256, 128>}, {transform_indices = @transform_2, window_bounds = array<i64: 1, 256>}, {transform_indices = @transform_3, window_bounds = array<i64: 1, 256>}, {transform_indices = @transform_4, window_bounds = array<i64: 1, 128>}, {transform_indices = @transform_5, window_bounds = array<i64: 512, 128>}]} {
    %c0_i32 = arith.constant 0 : i32
    %0 = arith.cmpi eq, %arg2, %c0_i32 : i32
    %1 = arith.extui %0 : i1 to i32
    %c0_i32_0 = arith.constant 0 : i32
    %2 = arith.cmpi ne, %1, %c0_i32_0 : i32
    scf.if %2 {
      %cst_10 = arith.constant 0.000000e+00 : f32
      %12 = vector.broadcast %cst_10 : f32 to vector<512x128xf32>
      %c0_11 = arith.constant 0 : index
      %c0_12 = arith.constant 0 : index
      %13 = vector.load %arg9[%c0_11, %c0_12] : memref<512x128xf32, #tpu.memory_space<vmem>>, vector<512x128xf32>
      tpu.vector_store %arg9[%c0_11, %c0_12], %12 {strides = array<i32>} : memref<512x128xf32, #tpu.memory_space<vmem>>, vector<512x128xf32>,
    } else {
    }
    %c0 = arith.constant 0 : index
    %c0_1 = arith.constant 0 : index
    %3 = vector.load %arg3[%c0, %c0_1] : memref<512x256xbf16, #tpu.memory_space<vmem>>, vector<512x256xbf16>
    %c0_2 = arith.constant 0 : index
    %c0_3 = arith.constant 0 : index
    %4 = vector.load %arg9[%c0_2, %c0_3] : memref<512x128xf32, #tpu.memory_space<vmem>>, vector<512x128xf32>
    %c0_4 = arith.constant 0 : index
    %c0_5 = arith.constant 0 : index
    %5 = vector.load %arg4[%c0_4, %c0_5] : memref<256x128xbf16, #tpu.memory_space<vmem>>, vector<256x128xbf16>
    %cst = arith.constant dense<0.000000e+00> : vector<512x128xf32>
    %6 = tpu.matmul %3, %5, %cst {dimension_numbers = #tpu.dot_dimension_numbers<[1], [0], [0], [1], [0, 0, 1, 1], [], []>} : vector<512x256xbf16>, vector<256x128xbf16>, vector<512x128xf32> -> vector<512x128xf32>
    %7 = arith.addf %4, %6 : vector<512x128xf32>
    %c0_6 = arith.constant 0 : index
    %c0_7 = arith.constant 0 : index
    %8 = vector.load %arg9[%c0_6, %c0_7] : memref<512x128xf32, #tpu.memory_space<vmem>>, vector<512x128xf32>
    tpu.vector_store %arg9[%c0_6, %c0_7], %7 {strides = array<i32>} : memref<512x128xf32, #tpu.memory_space<vmem>>, vector<512x128xf32>,
    %c0_i32_8 = arith.constant 0 : i32
    %9 = arith.cmpi eq, %arg2, %c0_i32_8 : i32
    %10 = arith.extui %9 : i1 to i32
    %c0_i32_9 = arith.constant 0 : i32
    %11 = arith.cmpi ne, %10, %c0_i32_9 : i32
    scf.if %11 {
      %c0_10 = arith.constant 0 : index
      %c0_11 = arith.constant 0 : index
      %12 = vector.load %arg9[%c0_10, %c0_11] : memref<512x128xf32, #tpu.memory_space<vmem>>, vector<512x128xf32>
      %c0_12 = arith.constant 0 : index
      %c0_13 = arith.constant 0 : index
      %13 = vector.load %arg7[%c0_12, %c0_13] : memref<1x128xf32, #tpu.memory_space<vmem>>, vector<1x128xf32>
      %14 = vector.broadcast %13 : vector<1x128xf32> to vector<512x128xf32>
      %15 = arith.addf %12, %14 : vector<512x128xf32>
      %c0_14 = arith.constant 0 : index
      %c0_15 = arith.constant 0 : index
      %16 = vector.load %arg8[%c0_14, %c0_15] : memref<512x128xf32, #tpu.memory_space<vmem>>, vector<512x128xf32>
      tpu.vector_store %arg8[%c0_14, %c0_15], %15 {strides = array<i32>} : memref<512x128xf32, #tpu.memory_space<vmem>>, vector<512x128xf32>,
    } else {
    }
    return
  }
  func.func @transform_0(%arg0: i32, %arg1: i32, %arg2: i32) -> (i32, i32) {
    %c0_i32 = arith.constant 0 : i32
    return %arg0, %arg2 : i32, i32
  }
  func.func @transform_1(%arg0: i32, %arg1: i32, %arg2: i32) -> (i32, i32) {
    %c0_i32 = arith.constant 0 : i32
    return %arg2, %arg1 : i32, i32
  }
  func.func @transform_2(%arg0: i32, %arg1: i32, %arg2: i32) -> (i32, i32) {
    %c0_i32 = arith.constant 0 : i32
    %c0_i32_0 = arith.constant 0 : i32
    return %c0_i32, %arg2 : i32, i32
  }
  func.func @transform_3(%arg0: i32, %arg1: i32, %arg2: i32) -> (i32, i32) {
    %c0_i32 = arith.constant 0 : i32
    %c0_i32_0 = arith.constant 0 : i32
    return %c0_i32, %arg2 : i32, i32
  }
  func.func @transform_4(%arg0: i32, %arg1: i32, %arg2: i32) -> (i32, i32) {
    %c0_i32 = arith.constant 0 : i32
    %c0_i32_0 = arith.constant 0 : i32
    return %c0_i32, %arg1 : i32, i32
  }
  func.func @transform_5(%arg0: i32, %arg1: i32, %arg2: i32) -> (i32, i32) {
    %c0_i32 = arith.constant 0 : i32
    return %arg0, %arg1 : i32, i32
  }
}

</mosaic_0001>

<bundles_post_ra>
// kernel: _matmul_padded.1
= control target key start
LH: loop header
LB: loop body
LE: loop exit
PB: predicated region body
PF: predicated region fallthrough
CT: control target
= control target key end

     0   :  { %10 = vsyncpa [#allocation4], 0  ;;  %s2695_s0 = inlined_call_operand.hbm [shape: bf16[2048,256], index: 0, kind: input, shape index: {}]   ;;  %s2696_s1 = inlined_call_operand.hbm [shape: bf16[256,128], index: 1, kind: input, shape index: {}]   ;;  %s2697_s2 = inlined_call_operand.vmem [shape: f32[1,256], index: 2, kind: input, shape index: {}]   ;;  %s2698_s3 = inlined_call_operand.vmem [shape: f32[1,256], index: 3, kind: input, shape index: {}]   ;;  %s2699_s4 = inlined_call_operand.vmem [shape: f32[1,128], index: 4, kind: input, shape index: {}]   ;;  %s2700_s5 = inlined_call_operand.hbm [shape: f32[2048,128], index: 5, kind: output, shape index: {}]  }
   0x1   :  { %12 = vsyncpa [#allocation4 + $0x1], 0 }
   0x2   :  { %13 = vsyncpa [#allocation7], 0 }
   0x3   :  { %14 = vsyncpa [#allocation5], 0 }
   0x4   :  { %16 = vsyncpa [#allocation5 + $0x1], 0  ;;  %s2278_s18 = smov 0   ;;  %s2280_s19 = smov 0  }
   0x5   :  { %s2282_s20 = smov 0   ;;  %s2284_s2 = smov 0  }
   0x6   :  { %s2286_s3 = smov 0   ;;  %s2288_s21 = smov 0  }
   0x7 LB: > { %s1769_s22 = sadd.s32 4294967295, %s2236_s21   ;;  %s1770_s23 = sadd.s32 4294967294, %s2236_s21   ;;  %s2236_s21 = sphi %s2288_s21, %s22_s21   ;;  %s2232_s3 = sphi %s2286_s3, %s2717_s3   ;;  %s2228_s2 = sphi %s2284_s2, %s2716_s2   ;;  %s2224_s20 = sphi %s2282_s20, %s2715_s20   ;;  %s2220_s19 = sphi %s2280_s19, %s2714_s19   ;;  %s2216_s18 = sphi %s2278_s18, %s2713_s18  }
   0x8   : > { %p63_p0 = scmp.ne.s32.totalorder %s2220_s19, %s2216_s18  ;;  %p2312_p1 = scmp.eq.s32.totalorder %s1769_s22, 0 }
   0x9   : > { %p2316_p2 = scmp.eq.s32.totalorder %s1769_s22, 3  ;;  %p201_p3 = scmp.eq.s32.totalorder %s1770_s23, 3 }
   0xa   : > { %p2322_p4 = por %p2312_p1, %p63_p0  ;;  %p1771_p5 = scmp.ge.s32.totalorder %s2236_s21, 1 }
   0xb   : > { %p2327_p6 = por %p201_p3, %p63_p0  ;;  %p208_p7 = scmp.lt.s32.totalorder %s2236_s21, 5 }
   0xc   : > { %s2238_s29 = smov [#allocation6]   ;;  %s41_s7 = sadd.s32 1, %s2232_s3 }
   0xd   : > { %s2705_s27 = scalar_select %p2327_p6, 1, 0 }
   0xe   : > { %p2332_p8 = pnand %p1771_p5, %p208_p7  ;;  %s224_s30 = sshll.u32 %s2238_s29, 4  ;;  %s225_s30 = int_to_ptr.vmem [resolvable:$true] %s224_s30 }
   0xf   : > { %s2109_s8 = scalar_lea.vmem %s225_s30, 2048  ;;  %p2117_p3 = scmp.lt.s32.totalorder %s225_s30, %s225_s30 }
  0x10   : > { %p1914_p9 = pneg %p2332_p8  ;;  %p2110_p12 = scmp.ne.s32.totalorder %s225_s30, %s2109_s8 }
  0x11   : > { %p2118_p5 = scmp.lt.s32.totalorder %s2109_s8, %s2109_s8 }
  0x12   : > { %p2340_p10 = pnand %p1914_p9, %p2312_p1 }
  0x13   : > { %p2119_p7 = por %p2118_p5, %p2117_p3 }
  0x14   : > { %p2100_p11 = pneg %p2340_p10 }
  0x16   : > { %p2112_p13 = pnand %p2110_p12, %p2100_p11 }
  0x18   : > { %p2113_p0 = pneg %p2112_p13 }
  0x1a   : > { %p2120_p6 = pnand %p2119_p7, %p2113_p0 }
  0x1c   : > { %2123 = shalt.err (!%p2120_p6)
}
  0x1d   : > { %s2239_s9 = smov 64   ;;  %s2240_s10 = smov 4  }
  0x1e   : > { %1917 = dma.hbm_to_vmem [thread:$0]  (!%p2340_p10), %s2696_s1, 2048, %s225_s30, [#allocation7], %s2239_s9, %s2239_s9, %s2240_s10  }
  0x1f   : > { %p43_p9 = scmp.ge.s32.totalorder %s41_s7, 4  ;;  %s50_s13 = sadd.s32 1, %s2224_s20 }
  0x20   : > { %p57_p6 = scmp.ne.s32.totalorder %s2224_s20, %s2220_s19  ;;  %p58_p11 = scmp.eq.s32.totalorder %s2236_s21, 0 }
  0x21   : > { %s2719_s7 = smov (%p43_p9, %s41_s7), 0  ;;  %p1927_p0 = scmp.lt.s32.totalorder %s2236_s21, 4 }
  0x22   : > { %p2358_p12 = por %p58_p11, %p57_p6  ;;  %p2364_p13 = por %p2316_p2, %p57_p6 }
  0x23   : > { %s45_s16 = ssub.s32 %s2232_s3, %s2719_s7  ;;  %s260_s17 = sand.u32 1, %s2224_s20  }
  0x24   : > { %s2709_s15 = scalar_select %p2364_p13, 1, 0 }
  0x25   : > { %p48_p10 = scmp.eq.s32.totalorder %s45_s16, 0  ;;  %s1777_s22 = sshll.u32 %s260_s17, 9 }
  0x26   : > { %s1872_s29 = sshll.u32 %s2232_s3, 13  ;;  %s264_s9 = scalar_lea.vmem [#allocation3], %s1777_s22 }
  0x27   : > { %s2373_s23 = scalar_select %p48_p10, %s2224_s20, %s50_s13  }
  0x28   : > { %s273_s8 = scalar_lea.hbm %s2695_s0, %s1872_s29  ;;  %s274_s10 = sshll.u32 %s264_s9, 4  ;;  %s275_s10 = int_to_ptr.vmem [resolvable:$true] %s274_s10 }
  0x29   : > { %p2381_p2 = pnand %p1927_p0, %p2358_p12  ;;  %s261_s11 = scalar_lea.sflag [#allocation4], %s260_s17 }
  0x2a   : > { %s2137_s12 = scalar_lea.vmem %s275_s10, 8192  ;;  %s2241_s13 = smov [#allocation3]  }
  0x2b   : > { %p2126_p3 = pneg %p2381_p2  ;;  %p2138_p5 = scmp.ne.s32.totalorder %s275_s10, %s2137_s12 }
  0x2c   : > { %s2142_s16 = sshll.u32 %s2241_s13, 4  ;;  %s2143_s16 = int_to_ptr.vmem [resolvable:$false] %s2142_s16 }
  0x2d   : > { %p2140_p7 = pnand %p2138_p5, %p2126_p3  ;;  %s2144_s29 = scalar_lea.vmem %s2143_s16, 16384 }
  0x2e   : > { %p2145_p6 = scmp.lt.s32.totalorder %s275_s10, %s2143_s16  ;;  %p2146_p11 = scmp.lt.s32.totalorder %s2144_s29, %s2137_s12 }
  0x2f   : > { %p2141_p9 = pneg %p2140_p7 }
  0x30   : > { %p2147_p10 = por %p2146_p11, %p2145_p6 }
  0x32   : > { %p2148_p13 = pnand %p2147_p10, %p2141_p9 }
  0x34   : > { %2151 = shalt.err (!%p2148_p13)
}
  0x35   : > { %s2242_s14 = smov 128   ;;  %s2243_s22 = smov 8  }
  0x36   : > { %1921 = dma.hbm_to_vmem [thread:$0]  (!%p2381_p2), %s273_s8, 8192, %s275_s10, %s261_s11, %s2242_s14, %s2242_s14, %s2243_s22  }
  0x37   : > { %286 = sbr.rel (%p2332_p8) target bundleno = 461 (0x1cd), region = 40  ;;  %s2392_s17 = sand.u32 (!%p2332_p8), 1, %s2220_s19  }
  0x38   : > { %s1782_s30 = sshll.u32 (!%p2332_p8), %s2392_s17, 9  ;;  %s289_s6 = scalar_lea.sflag (!%p2332_p8), [#allocation4], %s2392_s17 }
  0x39   : > { %s2398_s9 = scalar_lea.vmem (!%p2332_p8), [#allocation3], %s1782_s30 }
  0x3c   : > { %2203 = dma.done.wait (%p2322_p4), %s289_s6, 8192  }
  0x3d   : > { %2205 = vsyncadd (%p2322_p4), %s289_s6, 4294959104 }
  0x3e   : > { %2207 = dma.done.wait (%p2312_p1), [#allocation7], 2048  }
  0x3f   : > { %2209 = vsyncadd (%p2312_p1), [#allocation7], 4294965248  ;;  %v2244_v0 = vmov 0   ;;  %v1986_v1 = vld [vmem:[#allocation6 + $0x38] sm:$0xff]   ;;  %v1987_v2 = vld [vmem:[#allocation6 + $0x30] sm:$0xff]   ;;  %s2513_s28 = scalar_lea.vmem [#allocation8], %s1782_s30 }
  0x40   : > { %996 = vmatprep.subr.bf16.mxu0 %v2244_v0  ;;  %1874 = vmatprep.subr.bf16.mxu1 %v2244_v0  ;;  %v1988_v3 = vld [vmem:[#allocation6 + $0x28] sm:$0xff]   ;;  %v1989_v4 = vld [vmem:[#allocation6 + $0x20] sm:$0xff]   ;;  %v1990_v5 = vld [vmem:[#allocation6 + $0x18] sm:$0xff]   ;;  %s1873_s8 = sshll.u32 %s2228_s2, 13  ;;  %s1630_s10 = sshll.u32 %s2513_s28, 4  ;;  %s2644_s10 = int_to_ptr.vmem [resolvable:$true] %s1630_s10 }
  0x41   : > { %997 = vmatpush1.bf16.msra.mxu0 %v1986_v1  ;;  %1890 = vmatpush1.bf16.msra.mxu1 %v1986_v1  ;;  %v2004_v6 = vld [vmem:[%s2398_s9 + $0x4] ss:$8 sps:$4 sm:$0xff]   ;;  %v1991_v7 = vld [vmem:[#allocation6 + $0x10] sm:$0xff]   ;;  %v1994_v11 = vld [vmem:[#allocation6 + $0x78] sm:$0xff]   ;;  %s2642_s12 = scalar_lea.hbm %s2700_s5, %s1873_s8  ;;  %s1616_s2 = scalar_lea.sflag [#allocation5], %s2392_s17 }
  0x42   : > { %998 = vmatprep.subr.bf16.mxu0 %v2244_v0  ;;  %1875 = vmatprep.subr.bf16.mxu1 %v2244_v0  ;;  %v2007_v8 = vld [vmem:[%s2398_s9 + $0x104] ss:$8 sps:$4 sm:$0xff]   ;;  %v1995_v12 = vld [vmem:[#allocation6 + $0x70] sm:$0xff]   ;;  %v1998_v15 = vld [vmem:[#allocation6 + $0x58] sm:$0xff]   ;;  %s2152_s13 = scalar_lea.vmem %s2644_s10, 8192  ;;  %p2711_p4 = scmp.ne.s32.totalorder %s2709_s15, 0 }
  0x43   : > { %1028 = vmatprep.mubr.bf16.mxu0 %v2004_v6  ;;  %1156 = vmatprep.mubr.bf16.mxu1 %v2007_v8  ;;  %v1992_v9 = vld [vmem:[#allocation6 + $0x8] sm:$0xff]   ;;  %v1993_v10 = vld [vmem:[#allocation6] sm:$0xff]   ;;  %v1999_v16 = vld [vmem:[#allocation6 + $0x50] sm:$0xff]   ;;  %p2153_p1 = scmp.ne.s32.totalorder %s2644_s10, %s2152_s13  ;;  %s2245_s16 = smov [#allocation8]  }
  0x44   : > { %v1996_v13 = vld [vmem:[#allocation6 + $0x68] sm:$0xff]   ;;  %v1997_v14 = vld [vmem:[#allocation6 + $0x60] sm:$0xff]   ;;  %v2008_v21 = vld [vmem:[%s2398_s9 + $0x14] ss:$8 sps:$4 sm:$0xff]   ;;  %s2156_s29 = sshll.u32 %s2245_s16, 4  ;;  %s2157_s29 = int_to_ptr.vmem [resolvable:$false] %s2156_s29 }
  0x45   : > { %999 = vmatpush1.bf16.msra.mxu0 %v1987_v2  ;;  %1891 = vmatpush1.bf16.msra.mxu1 %v1987_v2  ;;  %v2000_v17 = vld [vmem:[#allocation6 + $0x48] sm:$0xff]   ;;  %v2001_v18 = vld [vmem:[#allocation6 + $0x40] sm:$0xff]   ;;  %v2010_v22 = vld [vmem:[%s2398_s9 + $0x114] ss:$8 sps:$4 sm:$0xff]   ;;  %p2154_p8 = pnand %p2153_p1, %p2711_p4  ;;  %s2158_s14 = scalar_lea.vmem %s2157_s29, 16384 }
  0x46   : > { %1000 = vmatprep.subr.bf16.mxu0 %v2244_v0  ;;  %1876 = vmatprep.subr.bf16.mxu1 %v2244_v0  ;;  %v2002_v19 = vld [vmem:[%s2398_s9] ss:$8 sps:$4 sm:$0xff]   ;;  %v2012_v23 = vld [vmem:[%s2398_s9 + $0x10] ss:$8 sps:$4 sm:$0xff]   ;;  %v2014_v25 = vld [vmem:[%s2398_s9 + $0x24] ss:$8 sps:$4 sm:$0xff]   ;;  %p2159_p13 = scmp.lt.s32.totalorder %s2644_s10, %s2157_s29  ;;  %p2160_p0 = scmp.lt.s32.totalorder %s2158_s14, %s2152_s13 }
  0x47   : > { %v2005_v20 = vld [vmem:[%s2398_s9 + $0x100] ss:$8 sps:$4 sm:$0xff]   ;;  %v2013_v24 = vld [vmem:[%s2398_s9 + $0x110] ss:$8 sps:$4 sm:$0xff]   ;;  %v2016_v26 = vld [vmem:[%s2398_s9 + $0x124] ss:$8 sps:$4 sm:$0xff]   ;;  %p2155_p12 = pneg %p2154_p8 }
  0x48   : > { %v2018_v27 = vld [vmem:[%s2398_s9 + $0x20] ss:$8 sps:$4 sm:$0xff]   ;;  %v2020_v29 = vld [vmem:[%s2398_s9 + $0x34] ss:$8 sps:$4 sm:$0xff]   ;;  %v2024_v31 = vld [vmem:[%s2398_s9 + $0x30] ss:$8 sps:$4 sm:$0xff]   ;;  %p2161_p2 = por %p2160_p0, %p2159_p13 }
  0x49   : > { %1001 = vmatpush1.bf16.msra.mxu0 %v1988_v3  ;;  %1892 = vmatpush1.bf16.msra.mxu1 %v1988_v3  ;;  %v2019_v28 = vld [vmem:[%s2398_s9 + $0x120] ss:$8 sps:$4 sm:$0xff]   ;;  %v2022_v30 = vld [vmem:[%s2398_s9 + $0x134] ss:$8 sps:$4 sm:$0xff]   ;;  %v2025_v32 = vld [vmem:[%s2398_s9 + $0x130] ss:$8 sps:$4 sm:$0xff]  }
  0x4a   : > { %1002 = vmatprep.subr.bf16.mxu0 %v2244_v0  ;;  %1877 = vmatprep.subr.bf16.mxu1 %v2244_v0  ;;  %v2026_v33 = vld [vmem:[%s2398_s9 + $0x44] ss:$8 sps:$4 sm:$0xff]   ;;  %v2030_v35 = vld [vmem:[%s2398_s9 + $0x40] ss:$8 sps:$4 sm:$0xff]   ;;  %v2032_v37 = vld [vmem:[%s2398_s9 + $0x54] ss:$8 sps:$4 sm:$0xff]   ;;  %p2162_p3 = pnand %p2161_p2, %p2155_p12 }
  0x4b   : > { %v2028_v34 = vld [vmem:[%s2398_s9 + $0x144] ss:$8 sps:$4 sm:$0xff]   ;;  %v2031_v36 = vld [vmem:[%s2398_s9 + $0x140] ss:$8 sps:$4 sm:$0xff]   ;;  %v2034_v38 = vld [vmem:[%s2398_s9 + $0x154] ss:$8 sps:$4 sm:$0xff]  }
  0x4c   : > { %v2036_v39 = vld [vmem:[%s2398_s9 + $0x50] ss:$8 sps:$4 sm:$0xff]   ;;  %v2038_v41 = vld [vmem:[%s2398_s9 + $0x64] ss:$8 sps:$4 sm:$0xff]   ;;  %v2042_v43 = vld [vmem:[%s2398_s9 + $0x60] ss:$8 sps:$4 sm:$0xff]  }
  0x4d   : > { %1003 = vmatpush1.bf16.msra.mxu0 %v1989_v4  ;;  %1893 = vmatpush1.bf16.msra.mxu1 %v1989_v4  ;;  %v2037_v40 = vld [vmem:[%s2398_s9 + $0x150] ss:$8 sps:$4 sm:$0xff]   ;;  %v2040_v42 = vld [vmem:[%s2398_s9 + $0x164] ss:$8 sps:$4 sm:$0xff]   ;;  %v2043_v44 = vld [vmem:[%s2398_s9 + $0x160] ss:$8 sps:$4 sm:$0xff]  }
  0x4e   : > { %1004 = vmatprep.subr.bf16.mxu0 %v2244_v0  ;;  %1878 = vmatprep.subr.bf16.mxu1 %v2244_v0  ;;  %v2044_v45 = vld [vmem:[%s2398_s9 + $0x74] ss:$8 sps:$4 sm:$0xff]   ;;  %v2048_v47 = vld [vmem:[%s2398_s9 + $0x70] ss:$8 sps:$4 sm:$0xff]   ;;  %v2050_v49 = vld [vmem:[%s2398_s9 + $0x84] ss:$8 sps:$4 sm:$0xff]  }
  0x4f   : > { %v2046_v46 = vld [vmem:[%s2398_s9 + $0x174] ss:$8 sps:$4 sm:$0xff]   ;;  %v2049_v48 = vld [vmem:[%s2398_s9 + $0x170] ss:$8 sps:$4 sm:$0xff]   ;;  %v2052_v50 = vld [vmem:[%s2398_s9 + $0x184] ss:$8 sps:$4 sm:$0xff]  }
  0x50   : > { %v2054_v51 = vld [vmem:[%s2398_s9 + $0x80] ss:$8 sps:$4 sm:$0xff]   ;;  %v2056_v53 = vld [vmem:[%s2398_s9 + $0x94] ss:$8 sps:$4 sm:$0xff]   ;;  %v2060_v55 = vld [vmem:[%s2398_s9 + $0x90] ss:$8 sps:$4 sm:$0xff]  }
  0x51   : > { %1005 = vmatpush1.bf16.msra.mxu0 %v1990_v5  ;;  %1894 = vmatpush1.bf16.msra.mxu1 %v1990_v5  ;;  %v2055_v52 = vld [vmem:[%s2398_s9 + $0x180] ss:$8 sps:$4 sm:$0xff]   ;;  %v2058_v54 = vld [vmem:[%s2398_s9 + $0x194] ss:$8 sps:$4 sm:$0xff]   ;;  %v2061_v56 = vld [vmem:[%s2398_s9 + $0x190] ss:$8 sps:$4 sm:$0xff]  }
  0x52   : > { %1006 = vmatprep.subr.bf16.mxu0 %v2244_v0  ;;  %1879 = vmatprep.subr.bf16.mxu1 %v2244_v0  ;;  %v2062_v57 = vld [vmem:[%s2398_s9 + $0xa4] ss:$8 sps:$4 sm:$0xff]   ;;  %v2066_v59 = vld [vmem:[%s2398_s9 + $0xa0] ss:$8 sps:$4 sm:$0xff]   ;;  %v2068_v61 = vld [vmem:[%s2398_s9 + $0xb4] ss:$8 sps:$4 sm:$0xff]  }
  0x53   : > { %v2064_v58 = vld [vmem:[%s2398_s9 + $0x1a4] ss:$8 sps:$4 sm:$0xff]   ;;  %v2067_v60 = vld [vmem:[%s2398_s9 + $0x1a0] ss:$8 sps:$4 sm:$0xff]   ;;  %v2070_v62 = vld [vmem:[%s2398_s9 + $0x1b4] ss:$8 sps:$4 sm:$0xff]  }
  0x54   : > { %v2072_v63 = vld [vmem:[%s2398_s9 + $0xb0] ss:$8 sps:$4 sm:$0xff]   ;;  %v2074_v1 = vld [vmem:[%s2398_s9 + $0xc4] ss:$8 sps:$4 sm:$0xff]   ;;  %v2078_v3 = vld [vmem:[%s2398_s9 + $0xc0] ss:$8 sps:$4 sm:$0xff]  }
  0x55   : > { %1007 = vmatpush1.bf16.msra.mxu0 %v1991_v7  ;;  %1895 = vmatpush1.bf16.msra.mxu1 %v1991_v7  ;;  %v2076_v2 = vld [vmem:[%s2398_s9 + $0x1c4] ss:$8 sps:$4 sm:$0xff]   ;;  %v2079_v4 = vld [vmem:[%s2398_s9 + $0x1c0] ss:$8 sps:$4 sm:$0xff]   ;;  %v2080_v5 = vld [vmem:[%s2398_s9 + $0xd4] ss:$8 sps:$4 sm:$0xff]  }
  0x56   : > { %1008 = vmatprep.subr.bf16.mxu0 %v2244_v0  ;;  %1880 = vmatprep.subr.bf16.mxu1 %v2244_v0  ;;  %v2082_v6 = vld [vmem:[%s2398_s9 + $0x1d4] ss:$8 sps:$4 sm:$0xff]   ;;  %v2084_v7 = vld [vmem:[%s2398_s9 + $0xd0] ss:$8 sps:$4 sm:$0xff]  }
  0x57   : > { %v2085_v8 = vld [vmem:[%s2398_s9 + $0x1d0] ss:$8 sps:$4 sm:$0xff]  }
  0x59   : > { %1009 = vmatpush1.bf16.msra.mxu0 %v1992_v9  ;;  %1896 = vmatpush1.bf16.msra.mxu1 %v1992_v9  ;;  %v2086_v9 = vld [vmem:[%s2398_s9 + $0xe4] ss:$8 sps:$4 sm:$0xff]  }
  0x5a   : > { %1010 = vmatprep.subr.bf16.mxu0 %v2244_v0  ;;  %1881 = vmatprep.subr.bf16.mxu1 %v2244_v0 }
  0x5d   : > { %1011 = vmatpush1.bf16.msra.mxu0 %v1993_v10  ;;  %1897 = vmatpush1.bf16.msra.mxu1 %v1993_v10  ;;  %v2088_v10 = vld [vmem:[%s2398_s9 + $0x1e4] ss:$8 sps:$4 sm:$0xff]  }
  0x5e   : > { %1012 = vmatprep.subr.bf16.mxu0 %v2244_v0  ;;  %1882 = vmatprep.subr.bf16.mxu1 %v2244_v0 }
  0x61   : > { %1013 = vmatpush2.bf16.msra.mxu0 %v1994_v11  ;;  %1898 = vmatpush2.bf16.msra.mxu1 %v1994_v11  ;;  %v2090_v11 = vld [vmem:[%s2398_s9 + $0xe0] ss:$8 sps:$4 sm:$0xff]  }
  0x62   : > { %1014 = vmatprep.subr.bf16.mxu0 %v2244_v0  ;;  %1883 = vmatprep.subr.bf16.mxu1 %v2244_v0 }
  0x65   : > { %1015 = vmatpush2.bf16.msra.mxu0 %v1995_v12  ;;  %1899 = vmatpush2.bf16.msra.mxu1 %v1995_v12  ;;  %v2091_v12 = vld [vmem:[%s2398_s9 + $0x1e0] ss:$8 sps:$4 sm:$0xff]  }
  0x66   : > { %1016 = vmatprep.subr.bf16.mxu0 %v2244_v0  ;;  %1884 = vmatprep.subr.bf16.mxu1 %v2244_v0 }
  0x69   : > { %1017 = vmatpush2.bf16.msra.mxu0 %v1996_v13  ;;  %1900 = vmatpush2.bf16.msra.mxu1 %v1996_v13  ;;  %v2092_v13 = vld [vmem:[%s2398_s9 + $0xf4] ss:$8 sps:$4 sm:$0xff]  }
  0x6a   : > { %1018 = vmatprep.subr.bf16.mxu0 %v2244_v0  ;;  %1885 = vmatprep.subr.bf16.mxu1 %v2244_v0 }
  0x6d   : > { %1019 = vmatpush2.bf16.msra.mxu0 %v1997_v14  ;;  %1901 = vmatpush2.bf16.msra.mxu1 %v1997_v14  ;;  %v2094_v14 = vld [vmem:[%s2398_s9 + $0x1f4] ss:$8 sps:$4 sm:$0xff]  }
  0x6e   : > { %1020 = vmatprep.subr.bf16.mxu0 %v2244_v0  ;;  %1886 = vmatprep.subr.bf16.mxu1 %v2244_v0 }
  0x71   : > { %1021 = vmatpush2.bf16.msra.mxu0 %v1998_v15  ;;  %1902 = vmatpush2.bf16.msra.mxu1 %v1998_v15  ;;  %v2096_v15 = vld [vmem:[%s2398_s9 + $0xf0] ss:$8 sps:$4 sm:$0xff]  }
  0x72   : > { %1022 = vmatprep.subr.bf16.mxu0 %v2244_v0  ;;  %1887 = vmatprep.subr.bf16.mxu1 %v2244_v0 }
  0x75   : > { %1023 = vmatpush2.bf16.msra.mxu0 %v1999_v16  ;;  %1903 = vmatpush2.bf16.msra.mxu1 %v1999_v16  ;;  %v2097_v16 = vld [vmem:[%s2398_s9 + $0x1f0] ss:$8 sps:$4 sm:$0xff]  }
  0x76   : > { %1024 = vmatprep.subr.bf16.mxu0 %v2244_v0  ;;  %1888 = vmatprep.subr.bf16.mxu1 %v2244_v0 }
  0x79   : > { %1025 = vmatpush2.bf16.msra.mxu0 %v2000_v17  ;;  %1904 = vmatpush2.bf16.msra.mxu1 %v2000_v17  ;;  %v2507_v17 = vld [vmem:[%s2699_s4] ss:$0 sm:$0xff] }
  0x7a   : > { %1026 = vmatprep.subr.bf16.mxu0 %v2244_v0  ;;  %1889 = vmatprep.subr.bf16.mxu1 %v2244_v0  ;;  %v2073_v0 = vld [vmem:[%s2398_s9 + $0x1b0] ss:$8 sps:$4 sm:$0xff]  }
  0x7d   : > { %1027 = vmatpush2.bf16.msra.mxu0 %v2001_v18  ;;  %1905 = vmatpush2.bf16.msra.mxu1 %v2001_v18 }
  0x80   : > { %1029 = vmatmul.mubr.bf16.vlgmr.msra.gmra.mxu0 %v2002_v19  ;;  %1157 = vmatmul.mubr.bf16.vlgmr.msra.gmra.mxu1 %v2005_v20 }
  0x81   : > { %1036 = vmatprep.mubr.bf16.mxu0 %v2008_v21  ;;  %1164 = vmatprep.mubr.bf16.mxu1 %v2010_v22 }
  0x88   : > { %1037 = vmatmul.mubr.bf16.gmra.mxu0 %v2012_v23  ;;  %1165 = vmatmul.mubr.bf16.gmra.mxu1 %v2013_v24 }
  0x89   : > { %1044 = vmatprep.mubr.bf16.mxu0 %v2014_v25  ;;  %1172 = vmatprep.mubr.bf16.mxu1 %v2016_v26 }
  0x90   : > { %1045 = vmatmul.mubr.bf16.gmra.mxu0 %v2018_v27  ;;  %1173 = vmatmul.mubr.bf16.gmra.mxu1 %v2019_v28 }
  0x91   : > { %1052 = vmatprep.mubr.bf16.mxu0 %v2020_v29  ;;  %1180 = vmatprep.mubr.bf16.mxu1 %v2022_v30 }
  0x98   : > { %1053 = vmatmul.mubr.bf16.gmra.mxu0 %v2024_v31  ;;  %1181 = vmatmul.mubr.bf16.gmra.mxu1 %v2025_v32 }
  0x99   : > { %1060 = vmatprep.mubr.bf16.mxu0 %v2026_v33  ;;  %1188 = vmatprep.mubr.bf16.mxu1 %v2028_v34 }
  0xa0   : > { %1061 = vmatmul.mubr.bf16.gmra.mxu0 %v2030_v35  ;;  %1189 = vmatmul.mubr.bf16.gmra.mxu1 %v2031_v36 }
  0xa1   : > { %1068 = vmatprep.mubr.bf16.mxu0 %v2032_v37  ;;  %1196 = vmatprep.mubr.bf16.mxu1 %v2034_v38 }
  0xa8   : > { %1069 = vmatmul.mubr.bf16.gmra.mxu0 %v2036_v39  ;;  %1197 = vmatmul.mubr.bf16.gmra.mxu1 %v2037_v40 }
  0xa9   : > { %1076 = vmatprep.mubr.bf16.mxu0 %v2038_v41  ;;  %1204 = vmatprep.mubr.bf16.mxu1 %v2040_v42 }
  0xb0   : > { %1077 = vmatmul.mubr.bf16.gmra.mxu0 %v2042_v43  ;;  %1205 = vmatmul.mubr.bf16.gmra.mxu1 %v2043_v44 }
  0xb1   : > { %1084 = vmatprep.mubr.bf16.mxu0 %v2044_v45  ;;  %1212 = vmatprep.mubr.bf16.mxu1 %v2046_v46 }
  0xb8   : > { %1085 = vmatmul.mubr.bf16.gmra.mxu0 %v2048_v47  ;;  %1213 = vmatmul.mubr.bf16.gmra.mxu1 %v2049_v48 }
  0xb9   : > { %1092 = vmatprep.mubr.bf16.mxu0 %v2050_v49  ;;  %1220 = vmatprep.mubr.bf16.mxu1 %v2052_v50 }
  0xc0   : > { %1093 = vmatmul.mubr.bf16.gmra.mxu0 %v2054_v51  ;;  %1221 = vmatmul.mubr.bf16.gmra.mxu1 %v2055_v52 }
  0xc1   : > { %1100 = vmatprep.mubr.bf16.mxu0 %v2056_v53  ;;  %1228 = vmatprep.mubr.bf16.mxu1 %v2058_v54 }
  0xc8   : > { %1101 = vmatmul.mubr.bf16.gmra.mxu0 %v2060_v55  ;;  %1229 = vmatmul.mubr.bf16.gmra.mxu1 %v2061_v56 }
  0xc9   : > { %1108 = vmatprep.mubr.bf16.mxu0 %v2062_v57  ;;  %1236 = vmatprep.mubr.bf16.mxu1 %v2064_v58 }
  0xd0   : > { %1109 = vmatmul.mubr.bf16.gmra.mxu0 %v2066_v59  ;;  %1237 = vmatmul.mubr.bf16.gmra.mxu1 %v2067_v60 }
  0xd1   : > { %1116 = vmatprep.mubr.bf16.mxu0 %v2068_v61  ;;  %1244 = vmatprep.mubr.bf16.mxu1 %v2070_v62 }
  0xd8   : > { %1117 = vmatmul.mubr.bf16.gmra.mxu0 %v2072_v63  ;;  %1245 = vmatmul.mubr.bf16.gmra.mxu1 %v2073_v0 }
  0xd9   : > { %1124 = vmatprep.mubr.bf16.mxu0 %v2074_v1  ;;  %1252 = vmatprep.mubr.bf16.mxu1 %v2076_v2 }
  0xe0   : > { %1125 = vmatmul.mubr.bf16.gmra.mxu0 %v2078_v3  ;;  %1253 = vmatmul.mubr.bf16.gmra.mxu1 %v2079_v4 }
  0xe1   : > { %1132 = vmatprep.mubr.bf16.mxu0 %v2080_v5  ;;  %1260 = vmatprep.mubr.bf16.mxu1 %v2082_v6 }
  0xe8   : > { %1133 = vmatmul.mubr.bf16.gmra.mxu0 %v2084_v7  ;;  %1261 = vmatmul.mubr.bf16.gmra.mxu1 %v2085_v8 }
  0xe9   : > { %1140 = vmatprep.mubr.bf16.mxu0 %v2086_v9  ;;  %1268 = vmatprep.mubr.bf16.mxu1 %v2088_v10 }
  0xf0   : > { %1141 = vmatmul.mubr.bf16.gmra.mxu0 %v2090_v11  ;;  %1269 = vmatmul.mubr.bf16.gmra.mxu1 %v2091_v12 }
  0xf1   : > { %1148 = vmatprep.mubr.bf16.mxu0 %v2092_v13  ;;  %1276 = vmatprep.mubr.bf16.mxu1 %v2094_v14 }
  0xf8   : > { %1149 = vmatmul.mubr.bf16.gmra.mxu0 %v2096_v15  ;;  %1277 = vmatmul.mubr.bf16.gmra.mxu1 %v2097_v16 }
 0x140   : > { %v1030_v18 = vpop.f32.mrf.mxu0  ;;  %v1158_v19 = vpop.f32.mrf.mxu1 }
 0x141   : > { %v1487_v20 = vadd.f32 %v2507_v17, %v1030_v18  ;;  %v1519_v21 = vadd.f32 %v2507_v17, %v1158_v19 }
 0x142   : > { %v1032_v22 = vpop.f32.mrf.mxu0  ;;  %v1160_v23 = vpop.f32.mrf.mxu1 }
 0x143   : > { %1551 = vst [vmem:[%s2513_s28] sm:$0xff] %v1487_v20  ;;  %1583 = vst [vmem:[%s2513_s28 + $0x100] sm:$0xff] %v1519_v21 }
 0x144   : > { %v1033_v24 = vpop.f32.mrf.mxu0  ;;  %v1161_v25 = vpop.f32.mrf.mxu1 }
 0x145   : > { %v1488_v26 = vadd.f32 %v2507_v17, %v1033_v24  ;;  %v1520_v27 = vadd.f32 %v2507_v17, %v1161_v25 }
 0x146   : > { %v1035_v28 = vpop.f32.mrf.mxu0  ;;  %v1163_v29 = vpop.f32.mrf.mxu1 }
 0x147   : > { %1552 = vst [vmem:[%s2513_s28 + $0x8] sm:$0xff] %v1488_v26  ;;  %1584 = vst [vmem:[%s2513_s28 + $0x108] sm:$0xff] %v1520_v27 }
 0x148   : > { %v1038_v30 = vpop.f32.mrf.mxu0  ;;  %v1166_v31 = vpop.f32.mrf.mxu1 }
 0x149   : > { %v1489_v32 = vadd.f32 %v2507_v17, %v1038_v30  ;;  %v1521_v33 = vadd.f32 %v2507_v17, %v1166_v31 }
 0x14a   : > { %v1040_v34 = vpop.f32.mrf.mxu0  ;;  %v1168_v35 = vpop.f32.mrf.mxu1 }
 0x14b   : > { %1553 = vst [vmem:[%s2513_s28 + $0x10] sm:$0xff] %v1489_v32  ;;  %1585 = vst [vmem:[%s2513_s28 + $0x110] sm:$0xff] %v1521_v33 }
 0x14c   : > { %v1041_v36 = vpop.f32.mrf.mxu0  ;;  %v1169_v37 = vpop.f32.mrf.mxu1 }
 0x14d   : > { %v1490_v38 = vadd.f32 %v2507_v17, %v1041_v36  ;;  %v1522_v39 = vadd.f32 %v2507_v17, %v1169_v37 }
 0x14e   : > { %v1043_v40 = vpop.f32.mrf.mxu0  ;;  %v1171_v41 = vpop.f32.mrf.mxu1 }
 0x14f   : > { %1554 = vst [vmem:[%s2513_s28 + $0x18] sm:$0xff] %v1490_v38  ;;  %1586 = vst [vmem:[%s2513_s28 + $0x118] sm:$0xff] %v1522_v39 }
 0x150   : > { %v1046_v42 = vpop.f32.mrf.mxu0  ;;  %v1174_v43 = vpop.f32.mrf.mxu1 }
 0x151   : > { %v1491_v44 = vadd.f32 %v2507_v17, %v1046_v42  ;;  %v1523_v45 = vadd.f32 %v2507_v17, %v1174_v43 }
 0x152   : > { %v1048_v46 = vpop.f32.mrf.mxu0  ;;  %v1176_v47 = vpop.f32.mrf.mxu1 }
 0x153   : > { %1555 = vst [vmem:[%s2513_s28 + $0x20] sm:$0xff] %v1491_v44  ;;  %1587 = vst [vmem:[%s2513_s28 + $0x120] sm:$0xff] %v1523_v45 }
 0x154   : > { %v1049_v48 = vpop.f32.mrf.mxu0  ;;  %v1177_v49 = vpop.f32.mrf.mxu1 }
 0x155   : > { %v1492_v50 = vadd.f32 %v2507_v17, %v1049_v48  ;;  %v1524_v51 = vadd.f32 %v2507_v17, %v1177_v49 }
 0x156   : > { %v1051_v52 = vpop.f32.mrf.mxu0  ;;  %v1179_v53 = vpop.f32.mrf.mxu1 }
 0x157   : > { %1556 = vst [vmem:[%s2513_s28 + $0x28] sm:$0xff] %v1492_v50  ;;  %1588 = vst [vmem:[%s2513_s28 + $0x128] sm:$0xff] %v1524_v51 }
 0x158   : > { %v1054_v54 = vpop.f32.mrf.mxu0  ;;  %v1182_v55 = vpop.f32.mrf.mxu1 }
 0x159   : > { %v1493_v56 = vadd.f32 %v2507_v17, %v1054_v54  ;;  %v1525_v57 = vadd.f32 %v2507_v17, %v1182_v55 }
 0x15a   : > { %v1056_v58 = vpop.f32.mrf.mxu0  ;;  %v1184_v59 = vpop.f32.mrf.mxu1 }
 0x15b   : > { %1557 = vst [vmem:[%s2513_s28 + $0x30] sm:$0xff] %v1493_v56  ;;  %1589 = vst [vmem:[%s2513_s28 + $0x130] sm:$0xff] %v1525_v57 }
 0x15c   : > { %v1057_v60 = vpop.f32.mrf.mxu0  ;;  %v1185_v61 = vpop.f32.mrf.mxu1 }
 0x15d   : > { %v1494_v62 = vadd.f32 %v2507_v17, %v1057_v60  ;;  %v1526_v63 = vadd.f32 %v2507_v17, %v1185_v61 }
 0x15e   : > { %v1059_v0 = vpop.f32.mrf.mxu0  ;;  %v1187_v1 = vpop.f32.mrf.mxu1 }
 0x15f   : > { %1558 = vst [vmem:[%s2513_s28 + $0x38] sm:$0xff] %v1494_v62  ;;  %1590 = vst [vmem:[%s2513_s28 + $0x138] sm:$0xff] %v1526_v63 }
 0x160   : > { %v1062_v2 = vpop.f32.mrf.mxu0  ;;  %v1190_v3 = vpop.f32.mrf.mxu1 }
 0x161   : > { %v1495_v4 = vadd.f32 %v2507_v17, %v1062_v2  ;;  %v1527_v5 = vadd.f32 %v2507_v17, %v1190_v3 }
 0x162   : > { %v1064_v6 = vpop.f32.mrf.mxu0  ;;  %v1192_v7 = vpop.f32.mrf.mxu1 }
 0x163   : > { %1559 = vst [vmem:[%s2513_s28 + $0x40] sm:$0xff] %v1495_v4  ;;  %1591 = vst [vmem:[%s2513_s28 + $0x140] sm:$0xff] %v1527_v5 }
 0x164   : > { %v1065_v8 = vpop.f32.mrf.mxu0  ;;  %v1193_v9 = vpop.f32.mrf.mxu1 }
 0x165   : > { %v1496_v10 = vadd.f32 %v2507_v17, %v1065_v8  ;;  %v1528_v11 = vadd.f32 %v2507_v17, %v1193_v9 }
 0x166   : > { %v1067_v12 = vpop.f32.mrf.mxu0  ;;  %v1195_v13 = vpop.f32.mrf.mxu1 }
 0x167   : > { %1560 = vst [vmem:[%s2513_s28 + $0x48] sm:$0xff] %v1496_v10  ;;  %1592 = vst [vmem:[%s2513_s28 + $0x148] sm:$0xff] %v1528_v11 }
 0x168   : > { %v1070_v14 = vpop.f32.mrf.mxu0  ;;  %v1198_v15 = vpop.f32.mrf.mxu1 }
 0x169   : > { %v1497_v16 = vadd.f32 %v2507_v17, %v1070_v14  ;;  %v1529_v18 = vadd.f32 %v2507_v17, %v1198_v15 }
 0x16a   : > { %v1072_v19 = vpop.f32.mrf.mxu0  ;;  %v1200_v20 = vpop.f32.mrf.mxu1 }
 0x16b   : > { %1561 = vst [vmem:[%s2513_s28 + $0x50] sm:$0xff] %v1497_v16  ;;  %1593 = vst [vmem:[%s2513_s28 + $0x150] sm:$0xff] %v1529_v18 }
 0x16c   : > { %v1073_v21 = vpop.f32.mrf.mxu0  ;;  %v1201_v22 = vpop.f32.mrf.mxu1 }
 0x16d   : > { %v1498_v23 = vadd.f32 %v2507_v17, %v1073_v21  ;;  %v1530_v24 = vadd.f32 %v2507_v17, %v1201_v22 }
 0x16e   : > { %v1075_v25 = vpop.f32.mrf.mxu0  ;;  %v1203_v26 = vpop.f32.mrf.mxu1 }
 0x16f   : > { %1562 = vst [vmem:[%s2513_s28 + $0x58] sm:$0xff] %v1498_v23  ;;  %1594 = vst [vmem:[%s2513_s28 + $0x158] sm:$0xff] %v1530_v24 }
 0x170   : > { %v1078_v27 = vpop.f32.mrf.mxu0  ;;  %v1206_v28 = vpop.f32.mrf.mxu1 }
 0x171   : > { %v1499_v29 = vadd.f32 %v2507_v17, %v1078_v27  ;;  %v1531_v30 = vadd.f32 %v2507_v17, %v1206_v28 }
 0x172   : > { %v1080_v31 = vpop.f32.mrf.mxu0  ;;  %v1208_v32 = vpop.f32.mrf.mxu1 }
 0x173   : > { %1563 = vst [vmem:[%s2513_s28 + $0x60] sm:$0xff] %v1499_v29  ;;  %1595 = vst [vmem:[%s2513_s28 + $0x160] sm:$0xff] %v1531_v30 }
 0x174   : > { %v1081_v33 = vpop.f32.mrf.mxu0  ;;  %v1209_v34 = vpop.f32.mrf.mxu1 }
 0x175   : > { %v1500_v35 = vadd.f32 %v2507_v17, %v1081_v33  ;;  %v1532_v36 = vadd.f32 %v2507_v17, %v1209_v34 }
 0x176   : > { %v1083_v37 = vpop.f32.mrf.mxu0  ;;  %v1211_v38 = vpop.f32.mrf.mxu1 }
 0x177   : > { %1564 = vst [vmem:[%s2513_s28 + $0x68] sm:$0xff] %v1500_v35  ;;  %1596 = vst [vmem:[%s2513_s28 + $0x168] sm:$0xff] %v1532_v36 }
 0x178   : > { %v1086_v39 = vpop.f32.mrf.mxu0  ;;  %v1214_v40 = vpop.f32.mrf.mxu1 }
 0x179   : > { %v1501_v41 = vadd.f32 %v2507_v17, %v1086_v39  ;;  %v1533_v42 = vadd.f32 %v2507_v17, %v1214_v40 }
 0x17a   : > { %v1088_v43 = vpop.f32.mrf.mxu0  ;;  %v1216_v44 = vpop.f32.mrf.mxu1 }
 0x17b   : > { %1565 = vst [vmem:[%s2513_s28 + $0x70] sm:$0xff] %v1501_v41  ;;  %1597 = vst [vmem:[%s2513_s28 + $0x170] sm:$0xff] %v1533_v42 }
 0x17c   : > { %v1089_v45 = vpop.f32.mrf.mxu0  ;;  %v1217_v46 = vpop.f32.mrf.mxu1 }
 0x17d   : > { %v1502_v47 = vadd.f32 %v2507_v17, %v1089_v45  ;;  %v1534_v48 = vadd.f32 %v2507_v17, %v1217_v46 }
 0x17e   : > { %v1091_v49 = vpop.f32.mrf.mxu0  ;;  %v1219_v50 = vpop.f32.mrf.mxu1 }
 0x17f   : > { %1566 = vst [vmem:[%s2513_s28 + $0x78] sm:$0xff] %v1502_v47  ;;  %1598 = vst [vmem:[%s2513_s28 + $0x178] sm:$0xff] %v1534_v48 }
 0x180   : > { %v1094_v51 = vpop.f32.mrf.mxu0  ;;  %v1222_v52 = vpop.f32.mrf.mxu1 }
 0x181   : > { %v1503_v53 = vadd.f32 %v2507_v17, %v1094_v51  ;;  %v1535_v54 = vadd.f32 %v2507_v17, %v1222_v52 }
 0x182   : > { %v1096_v55 = vpop.f32.mrf.mxu0  ;;  %v1224_v56 = vpop.f32.mrf.mxu1 }
 0x183   : > { %1567 = vst [vmem:[%s2513_s28 + $0x80] sm:$0xff] %v1503_v53  ;;  %1599 = vst [vmem:[%s2513_s28 + $0x180] sm:$0xff] %v1535_v54 }
 0x184   : > { %v1097_v57 = vpop.f32.mrf.mxu0  ;;  %v1225_v58 = vpop.f32.mrf.mxu1 }
 0x185   : > { %v1504_v59 = vadd.f32 %v2507_v17, %v1097_v57  ;;  %v1536_v60 = vadd.f32 %v2507_v17, %v1225_v58 }
 0x186   : > { %v1099_v61 = vpop.f32.mrf.mxu0  ;;  %v1227_v62 = vpop.f32.mrf.mxu1 }
 0x187   : > { %1568 = vst [vmem:[%s2513_s28 + $0x88] sm:$0xff] %v1504_v59  ;;  %1600 = vst [vmem:[%s2513_s28 + $0x188] sm:$0xff] %v1536_v60 }
 0x188   : > { %v1102_v63 = vpop.f32.mrf.mxu0  ;;  %v1230_v0 = vpop.f32.mrf.mxu1 }
 0x189   : > { %v1505_v1 = vadd.f32 %v2507_v17, %v1102_v63  ;;  %v1537_v2 = vadd.f32 %v2507_v17, %v1230_v0 }
 0x18a   : > { %v1104_v3 = vpop.f32.mrf.mxu0  ;;  %v1232_v4 = vpop.f32.mrf.mxu1 }
 0x18b   : > { %1569 = vst [vmem:[%s2513_s28 + $0x90] sm:$0xff] %v1505_v1  ;;  %1601 = vst [vmem:[%s2513_s28 + $0x190] sm:$0xff] %v1537_v2 }
 0x18c   : > { %v1105_v5 = vpop.f32.mrf.mxu0  ;;  %v1233_v6 = vpop.f32.mrf.mxu1 }
 0x18d   : > { %v1506_v7 = vadd.f32 %v2507_v17, %v1105_v5  ;;  %v1538_v8 = vadd.f32 %v2507_v17, %v1233_v6 }
 0x18e   : > { %v1107_v9 = vpop.f32.mrf.mxu0  ;;  %v1235_v10 = vpop.f32.mrf.mxu1 }
 0x18f   : > { %1570 = vst [vmem:[%s2513_s28 + $0x98] sm:$0xff] %v1506_v7  ;;  %1602 = vst [vmem:[%s2513_s28 + $0x198] sm:$0xff] %v1538_v8 }
 0x190   : > { %v1110_v11 = vpop.f32.mrf.mxu0  ;;  %v1238_v12 = vpop.f32.mrf.mxu1 }
 0x191   : > { %v1507_v13 = vadd.f32 %v2507_v17, %v1110_v11  ;;  %v1539_v14 = vadd.f32 %v2507_v17, %v1238_v12 }
 0x192   : > { %v1112_v15 = vpop.f32.mrf.mxu0  ;;  %v1240_v16 = vpop.f32.mrf.mxu1 }
 0x193   : > { %1571 = vst [vmem:[%s2513_s28 + $0xa0] sm:$0xff] %v1507_v13  ;;  %1603 = vst [vmem:[%s2513_s28 + $0x1a0] sm:$0xff] %v1539_v14 }
 0x194   : > { %v1113_v18 = vpop.f32.mrf.mxu0  ;;  %v1241_v19 = vpop.f32.mrf.mxu1 }
 0x195   : > { %v1508_v20 = vadd.f32 %v2507_v17, %v1113_v18  ;;  %v1540_v21 = vadd.f32 %v2507_v17, %v1241_v19 }
 0x196   : > { %v1115_v22 = vpop.f32.mrf.mxu0  ;;  %v1243_v23 = vpop.f32.mrf.mxu1 }
 0x197   : > { %1572 = vst [vmem:[%s2513_s28 + $0xa8] sm:$0xff] %v1508_v20  ;;  %1604 = vst [vmem:[%s2513_s28 + $0x1a8] sm:$0xff] %v1540_v21 }
 0x198   : > { %v1118_v24 = vpop.f32.mrf.mxu0  ;;  %v1246_v25 = vpop.f32.mrf.mxu1 }
 0x199   : > { %v1509_v26 = vadd.f32 %v2507_v17, %v1118_v24  ;;  %v1541_v27 = vadd.f32 %v2507_v17, %v1246_v25 }
 0x19a   : > { %v1120_v28 = vpop.f32.mrf.mxu0  ;;  %v1248_v29 = vpop.f32.mrf.mxu1 }
 0x19b   : > { %1573 = vst [vmem:[%s2513_s28 + $0xb0] sm:$0xff] %v1509_v26  ;;  %1605 = vst [vmem:[%s2513_s28 + $0x1b0] sm:$0xff] %v1541_v27 }
 0x19c   : > { %v1121_v30 = vpop.f32.mrf.mxu0  ;;  %v1249_v31 = vpop.f32.mrf.mxu1 }
 0x19d   : > { %v1510_v32 = vadd.f32 %v2507_v17, %v1121_v30  ;;  %v1542_v33 = vadd.f32 %v2507_v17, %v1249_v31 }
 0x19e   : > { %v1123_v34 = vpop.f32.mrf.mxu0  ;;  %v1251_v35 = vpop.f32.mrf.mxu1 }
 0x19f   : > { %1574 = vst [vmem:[%s2513_s28 + $0xb8] sm:$0xff] %v1510_v32  ;;  %1606 = vst [vmem:[%s2513_s28 + $0x1b8] sm:$0xff] %v1542_v33 }
 0x1a0   : > { %v1126_v36 = vpop.f32.mrf.mxu0  ;;  %v1254_v37 = vpop.f32.mrf.mxu1 }
 0x1a1   : > { %v1511_v38 = vadd.f32 %v2507_v17, %v1126_v36  ;;  %v1543_v39 = vadd.f32 %v2507_v17, %v1254_v37 }
 0x1a2   : > { %v1128_v40 = vpop.f32.mrf.mxu0  ;;  %v1256_v41 = vpop.f32.mrf.mxu1 }
 0x1a3   : > { %1575 = vst [vmem:[%s2513_s28 + $0xc0] sm:$0xff] %v1511_v38  ;;  %1607 = vst [vmem:[%s2513_s28 + $0x1c0] sm:$0xff] %v1543_v39 }
 0x1a4   : > { %v1129_v42 = vpop.f32.mrf.mxu0  ;;  %v1257_v43 = vpop.f32.mrf.mxu1 }
 0x1a5   : > { %v1512_v44 = vadd.f32 %v2507_v17, %v1129_v42  ;;  %v1544_v45 = vadd.f32 %v2507_v17, %v1257_v43 }
 0x1a6   : > { %v1131_v46 = vpop.f32.mrf.mxu0  ;;  %v1259_v47 = vpop.f32.mrf.mxu1 }
 0x1a7   : > { %1576 = vst [vmem:[%s2513_s28 + $0xc8] sm:$0xff] %v1512_v44  ;;  %1608 = vst [vmem:[%s2513_s28 + $0x1c8] sm:$0xff] %v1544_v45 }
 0x1a8   : > { %v1134_v48 = vpop.f32.mrf.mxu0  ;;  %v1262_v49 = vpop.f32.mrf.mxu1 }
 0x1a9   : > { %v1513_v50 = vadd.f32 %v2507_v17, %v1134_v48  ;;  %v1545_v51 = vadd.f32 %v2507_v17, %v1262_v49 }
 0x1aa   : > { %v1136_v52 = vpop.f32.mrf.mxu0  ;;  %v1264_v53 = vpop.f32.mrf.mxu1 }
 0x1ab   : > { %1577 = vst [vmem:[%s2513_s28 + $0xd0] sm:$0xff] %v1513_v50  ;;  %1609 = vst [vmem:[%s2513_s28 + $0x1d0] sm:$0xff] %v1545_v51 }
 0x1ac   : > { %v1137_v54 = vpop.f32.mrf.mxu0  ;;  %v1265_v55 = vpop.f32.mrf.mxu1 }
 0x1ad   : > { %v1514_v56 = vadd.f32 %v2507_v17, %v1137_v54  ;;  %v1546_v57 = vadd.f32 %v2507_v17, %v1265_v55 }
 0x1ae   : > { %v1139_v58 = vpop.f32.mrf.mxu0  ;;  %v1267_v59 = vpop.f32.mrf.mxu1 }
 0x1af   : > { %1578 = vst [vmem:[%s2513_s28 + $0xd8] sm:$0xff] %v1514_v56  ;;  %1610 = vst [vmem:[%s2513_s28 + $0x1d8] sm:$0xff] %v1546_v57 }
 0x1b0   : > { %v1142_v60 = vpop.f32.mrf.mxu0  ;;  %v1270_v61 = vpop.f32.mrf.mxu1 }
 0x1b1   : > { %v1515_v62 = vadd.f32 %v2507_v17, %v1142_v60  ;;  %v1547_v63 = vadd.f32 %v2507_v17, %v1270_v61 }
 0x1b2   : > { %v1144_v0 = vpop.f32.mrf.mxu0  ;;  %v1272_v1 = vpop.f32.mrf.mxu1 }
 0x1b3   : > { %1579 = vst [vmem:[%s2513_s28 + $0xe0] sm:$0xff] %v1515_v62  ;;  %1611 = vst [vmem:[%s2513_s28 + $0x1e0] sm:$0xff] %v1547_v63 }
 0x1b4   : > { %v1145_v2 = vpop.f32.mrf.mxu0  ;;  %v1273_v3 = vpop.f32.mrf.mxu1 }
 0x1b5   : > { %v1516_v4 = vadd.f32 %v2507_v17, %v1145_v2  ;;  %v1548_v5 = vadd.f32 %v2507_v17, %v1273_v3 }
 0x1b6   : > { %v1147_v6 = vpop.f32.mrf.mxu0  ;;  %v1275_v7 = vpop.f32.mrf.mxu1 }
 0x1b7   : > { %1580 = vst [vmem:[%s2513_s28 + $0xe8] sm:$0xff] %v1516_v4  ;;  %1612 = vst [vmem:[%s2513_s28 + $0x1e8] sm:$0xff] %v1548_v5 }
 0x1b8   : > { %v1150_v8 = vpop.f32.mrf.mxu0  ;;  %v1278_v9 = vpop.f32.mrf.mxu1 }
 0x1b9   : > { %v1517_v10 = vadd.f32 %v2507_v17, %v1150_v8  ;;  %v1549_v11 = vadd.f32 %v2507_v17, %v1278_v9 }
 0x1ba   : > { %v1152_v12 = vpop.f32.mrf.mxu0  ;;  %v1280_v13 = vpop.f32.mrf.mxu1 }
 0x1bb   : > { %1581 = vst [vmem:[%s2513_s28 + $0xf0] sm:$0xff] %v1517_v10  ;;  %1613 = vst [vmem:[%s2513_s28 + $0x1f0] sm:$0xff] %v1549_v11 }
 0x1bc   : > { %v1153_v14 = vpop.f32.mrf.mxu0  ;;  %v1281_v15 = vpop.f32.mrf.mxu1 }
 0x1bd   : > { %v1518_v16 = vadd.f32 %v2507_v17, %v1153_v14  ;;  %v1550_v18 = vadd.f32 %v2507_v17, %v1281_v15 }
 0x1be   : > { %v1155_v19 = vpop.f32.mrf.mxu0  ;;  %v1283_v20 = vpop.f32.mrf.mxu1 }
 0x1bf   : > { %1582 = vst [vmem:[%s2513_s28 + $0xf8] sm:$0xff] %v1518_v16  ;;  %1614 = vst [vmem:[%s2513_s28 + $0x1f8] sm:$0xff] %v1550_v18 }
 0x1c0   : > { %2165 = shalt.err (!%p2162_p3)
}
 0x1c1   : > { %s2166_s22 = scalar_lea.hbm %s2642_s12, 8192  ;;  %s2170_s9 = scalar_lea.hbm %s2700_s5, 32768 }
 0x1c2   : > { %p2167_p5 = scmp.ne.s32.totalorder %s2642_s12, %s2166_s22  ;;  %p2171_p6 = scmp.lt.s32.totalorder %s2642_s12, %s2700_s5 }
 0x1c3   : > { %p2172_p11 = scmp.lt.s32.totalorder %s2170_s9, %s2166_s22 }
 0x1c4   : > { %p2168_p7 = pnand %p2167_p5, %p2711_p4 }
 0x1c5   : > { %p2173_p10 = por %p2172_p11, %p2171_p6 }
 0x1c6   : > { %p2169_p9 = pneg %p2168_p7 }
 0x1c8   : > { %p2174_p1 = pnand %p2173_p10, %p2169_p9 }
 0x1ca   : > { %2177 = shalt.err (!%p2174_p1)
}
 0x1cb   : > { %s2246_s28 = smov 128   ;;  %s2247_s8 = smov 8  }
 0x1cc   : > { %1912 = dma.vmem_to_hbm [thread:$0]  (%p2711_p4), %s2644_s10, 8192, %s2642_s12, %s1616_s2, %s2246_s28, %s2246_s28, %s2247_s8  }
 0x1cd PF: > { %p1929_p8 = scmp.ge.s32.totalorder %s2236_s21, 2  ;;  %s1645_s25 = sand.u32 1, %s2216_s18  }
 0x1ce   : > { %p2712_p12 = scmp.ne.s32.totalorder %s2705_s27, 0  ;;  %s1646_s11 = scalar_lea.sflag [#allocation5], %s1645_s25 }
 0x1d0   : > { %p1923_p13 = pnand %p1929_p8, %p2712_p12 }
 0x1d2   : > { %p1924_p0 = pneg %p1923_p13 }
 0x1d4   : > { %2211 = dma.done.wait (%p1924_p0), %s1646_s11, 8192  }
 0x1d5   : > { %2213 = vsyncadd (%p1924_p0), %s1646_s11, 4294959104  ;;  %s22_s21 = sadd.s32 1, %s2236_s21   ;;  %s2713_s18 = smov %s2220_s19 }
 0x1d6   : > { %p19_p2 = scmp.ge.s32.totalorder %s22_s21, 6   ;;  %s2714_s19 = smov %s2224_s20 }
 0x1d7   : > { %s2715_s20 = smov %s2373_s23  ;;  %s2716_s2 = smov %s2232_s3 }
 0x1d8   : > { %s2717_s3 = smov %s2719_s7  ;;  %21 = sbr.rel (!%p19_p2) target bundleno = 7 (0x7), region = 107 }
 0x1dd   :  { %1651 = vsyncpa [#allocation4], 1 }
 0x1de   :  { %1653 = vsyncpa [#allocation4 + $0x1], 1 }
 0x1df   :  { %1654 = vsyncpa [#allocation7], 1 }
 0x1e0   :  { %1655 = vsyncpa [#allocation5], 1 }
 0x1e1   :  { %1657 = vsyncpa [#allocation5 + $0x1], 1 }

</bundles_post_ra>
